<compile_context>
chip_gen: v5e
topology: v5e:2x2
jax: 0.10.0
libtpu: 0.0.40
codegen_flags: <defaults>
</compile_context>

<pallas_src>
import functools

import jax
import jax.numpy as jnp
from jax.experimental import pallas as pl
from jax.experimental.pallas import tpu as pltpu


def _mean_and_conv_kernel(x_ref, w_ref, b_ref, o_ref, *,
                          stride, ksize, c_in, c_out, l_out):
    """Processes one batch element.

    x_ref: (1, stride*C_in, L')   polyphase input, L' = L_out + (K-1)//stride
    w_ref: (C_out, K*C_in)        Conv1d weight, columns ordered k-major then c
    b_ref: (C_out, 1)             bias (broadcasts over lanes)
    o_ref: (1, C_out + C_in, L_out)
    """
    x = x_ref[0]                                   # (stride*C_in, L')
    w = w_ref[...]                                 # (C_out, K*C_in)

    # f32 accumulator seeded with the bias (broadcast over lanes).
    acc = jnp.zeros((c_out, l_out), jnp.float32) + b_ref[...].astype(jnp.float32)

    # Taps grouped by shift q = k // stride.  For a given q, phases
    # r = 0..n_r-1 are contiguous rows of x_poly and contiguous columns of the
    # k-major flattened weight, so each group is a single contiguous-slice
    # MXU matmul.  n_shifts = ceil(K/stride) is tiny and static.
    n_shifts = (ksize + stride - 1) // stride
    for q in range(n_shifts):
        n_r = min(stride, ksize - q * stride)
        rows = n_r * c_in
        x_q = x[0:rows, q:q + l_out]                               # (rows, L_out)
        w_q = w[:, q * stride * c_in:q * stride * c_in + rows]      # (C_out, rows)
        acc = acc + jnp.dot(w_q, x_q, preferred_element_type=jnp.float32)

    o_ref[0, 0:c_out, :] = acc.astype(o_ref.dtype)
    # Downsample branch (nearest, scale 1/stride) == phase-0 / shift-0 rows.
    o_ref[0, c_out:c_out + c_in, :] = x[0:c_in, 0:l_out]


def mean_and_conv(x_ncl, weight, bias, *, stride):
    """Pallas version of _MeanAndConv.forward.

    x_ncl:  (B, C_in, L)      -- PyTorch NCL input (kept NCL throughout)
    weight: (C_out, C_in, K)  -- nn.Conv1d weight
    bias:   (C_out,)          -- nn.Conv1d bias
    returns (B, C_out + C_in, L_out) with L_out = (L - K)//stride + 1
    """
    B, C_in, L = x_ncl.shape
    C_out, _, K = weight.shape
    L_out = (L - K) // stride + 1
    assert L_out >= 1 and L // stride >= L_out, "shape combo invalid for _MeanAndConv"

    # Polyphase reshape: x_poly[b, r*C_in + c, l'] = x[b, c, l'*stride + r].
    q_max = (K - 1) // stride
    Lp = L_out + q_max
    target = stride * Lp
    if target > L:
        # Padded zeros are never read: max index touched is
        # (L_out-1)*stride + K-1 <= L-1.
        x = jnp.pad(x_ncl, ((0, 0), (0, 0), (0, target - L)))
    else:
        x = x_ncl[:, :, :target]  # dropped tail elements are never needed
    x_poly = x.reshape(B, C_in, Lp, stride)
    x_poly = jnp.transpose(x_poly, (0, 3, 1, 2)).reshape(B, stride * C_in, Lp)

    # Flatten weight so column index = k*C_in + c (k-major), matching the
    # per-shift grouping used in the kernel.
    w_flat = jnp.transpose(weight, (0, 2, 1)).reshape(C_out, K * C_in)
    b_2d = bias.reshape(C_out, 1)

    kernel = functools.partial(_mean_and_conv_kernel,
                               stride=stride, ksize=K, c_in=C_in,
                               c_out=C_out, l_out=L_out)
    out = pl.pallas_call(
        kernel,
        out_shape=jax.ShapeDtypeStruct((B, C_out + C_in, L_out), x_ncl.dtype),
        grid=(B,),
        in_specs=[
            pl.BlockSpec((1, stride * C_in, Lp), lambda b: (b, 0, 0)),
            pl.BlockSpec((C_out, K * C_in), lambda b: (0, 0)),
            pl.BlockSpec((C_out, 1), lambda b: (0, 0)),
        ],
        out_specs=pl.BlockSpec((1, C_out + C_in, L_out), lambda b: (b, 0, 0)),
        compiler_params=pltpu.CompilerParams(
            dimension_semantics=("parallel",)),
    )(x_poly, w_flat, b_2d)
    # TODO(synk): for very long sequences also tile L_out (with a (K-1)//stride
    # halo on the x window) so per-step blocks stay within scoped VMEM.
    return out


def _reference(x_ncl, weight, bias, *, stride):
    """Pure-JAX reference of the PyTorch forward (for correctness check)."""
    conv = jax.lax.conv_general_dilated(
        x_ncl, weight, window_strides=(stride,), padding='VALID',
        dimension_numbers=('NCH', 'OIH', 'NCH'))
    conv = conv + bias[None, :, None]
    l_out = conv.shape[-1]
    ds = x_ncl[:, :, ::stride][..., :l_out]   # nearest interpolate, scale 1/stride
    return jnp.concatenate([conv, ds], axis=1)


if __name__ == "__main__":
    key = jax.random.PRNGKey(0)
    kx, kw, kb = jax.random.split(key, 3)

    # _MeanAndConv(inp=4, output=8, kernel=3, stride=2)
    B, C_in, L = 2, 4, 16
    C_out, K, STRIDE = 8, 3, 2

    x = jax.random.normal(kx, (B, C_in, L), dtype=jnp.float32)
    weight = jax.random.normal(kw, (C_out, C_in, K), dtype=jnp.float32) * 0.1
    bias = jax.random.normal(kb, (C_out,), dtype=jnp.float32) * 0.1

    fn = jax.jit(functools.partial(mean_and_conv, stride=STRIDE))
    out = jax.block_until_ready(fn(x, weight, bias))

    ref = _reference(x, weight, bias, stride=STRIDE)
    assert out.shape == (B, C_out + C_in, (L - K) // STRIDE + 1), out.shape
    assert jnp.allclose(out, ref, atol=1e-4, rtol=1e-4), float(jnp.max(jnp.abs(out - ref)))

    print("KERNEL_OK")
</pallas_src>

<mosaic_0001>
module attributes {stable_mosaic.version = 11 : i64} {
  func.func @_mean_and_conv_kernel(%arg0: i32, %arg1: memref<1x8x8xf32, #tpu.memory_space<vmem>>, %arg2: memref<8x12xf32, #tpu.memory_space<vmem>>, %arg3: memref<8x1xf32, #tpu.memory_space<vmem>>, %arg4: memref<1x12x7xf32, #tpu.memory_space<vmem>>) attributes {dimension_semantics = [#tpu.dimension_semantics<parallel>], iteration_bounds = array<i64: 2>, scalar_prefetch = 0 : i64, scratch_operands = 0 : i64, tpu.core_type = #tpu.core_type<tc>, window_params = [{transform_indices = @transform_0, window_bounds = array<i64: 1, 8, 8>}, {pipeline_mode = #tpu.pipeline_mode<synchronous>, transform_indices = @transform_1, window_bounds = array<i64: 8, 12>}, {pipeline_mode = #tpu.pipeline_mode<synchronous>, transform_indices = @transform_2, window_bounds = array<i64: 8, 1>}, {transform_indices = @transform_3, window_bounds = array<i64: 1, 12, 7>}]} {
    %c0 = arith.constant 0 : index
    %c0_0 = arith.constant 0 : index
    %c0_1 = arith.constant 0 : index
    %0 = vector.load %arg1[%c0, %c0_0, %c0_1] : memref<1x8x8xf32, #tpu.memory_space<vmem>>, vector<1x8x8xf32>
    %1 = vector.shape_cast %0 : vector<1x8x8xf32> to vector<8x8xf32>
    %c0_2 = arith.constant 0 : index
    %c0_3 = arith.constant 0 : index
    %2 = vector.load %arg2[%c0_2, %c0_3] : memref<8x12xf32, #tpu.memory_space<vmem>>, vector<8x12xf32>
    %cst = arith.constant 0.000000e+00 : f32
    %3 = vector.broadcast %cst : f32 to vector<8x7xf32>
    %c0_4 = arith.constant 0 : index
    %c0_5 = arith.constant 0 : index
    %4 = vector.load %arg3[%c0_4, %c0_5] : memref<8x1xf32, #tpu.memory_space<vmem>>, vector<8x1xf32>
    %5 = vector.broadcast %4 : vector<8x1xf32> to vector<8x7xf32>
    %6 = arith.addf %3, %5 : vector<8x7xf32>
    %7 = vector.extract_strided_slice %1 {offsets = [0, 0], sizes = [8, 7], strides = [1, 1]} : vector<8x8xf32> to vector<8x7xf32>
    %8 = vector.extract_strided_slice %2 {offsets = [0, 0], sizes = [8, 8], strides = [1, 1]} : vector<8x12xf32> to vector<8x8xf32>
    %cst_6 = arith.constant dense<0.000000e+00> : vector<8x7xf32>
    %9 = tpu.matmul %8, %7, %cst_6 {dimension_numbers = #tpu.dot_dimension_numbers<[1], [0], [0], [1], [0, 0, 1, 1], [], []>} : vector<8x8xf32>, vector<8x7xf32>, vector<8x7xf32> -> vector<8x7xf32>
    %10 = arith.addf %6, %9 : vector<8x7xf32>
    %11 = vector.extract_strided_slice %1 {offsets = [0, 1], sizes = [4, 7], strides = [1, 1]} : vector<8x8xf32> to vector<4x7xf32>
    %12 = vector.extract_strided_slice %2 {offsets = [0, 8], sizes = [8, 4], strides = [1, 1]} : vector<8x12xf32> to vector<8x4xf32>
    %cst_7 = arith.constant dense<0.000000e+00> : vector<8x7xf32>
    %13 = tpu.matmul %12, %11, %cst_7 {dimension_numbers = #tpu.dot_dimension_numbers<[1], [0], [0], [1], [0, 0, 1, 1], [], []>} : vector<8x4xf32>, vector<4x7xf32>, vector<8x7xf32> -> vector<8x7xf32>
    %14 = arith.addf %10, %13 : vector<8x7xf32>
    %c0_8 = arith.constant 0 : index
    %c0_9 = arith.constant 0 : index
    %c0_10 = arith.constant 0 : index
    %15 = vector.load %arg4[%c0_8, %c0_9, %c0_10] : memref<1x12x7xf32, #tpu.memory_space<vmem>>, vector<1x8x7xf32>
    %16 = vector.shape_cast %15 : vector<1x8x7xf32> to vector<8x7xf32>
    %17 = vector.shape_cast %14 : vector<8x7xf32> to vector<1x8x7xf32>
    tpu.vector_store %arg4[%c0_8, %c0_9, %c0_10], %17 {strides = array<i32>} : memref<1x12x7xf32, #tpu.memory_space<vmem>>, vector<1x8x7xf32>,
    %18 = vector.extract_strided_slice %1 {offsets = [0, 0], sizes = [4, 7], strides = [1, 1]} : vector<8x8xf32> to vector<4x7xf32>
    %c0_11 = arith.constant 0 : index
    %c8 = arith.constant 8 : index
    %c0_12 = arith.constant 0 : index
    %19 = vector.load %arg4[%c0_11, %c8, %c0_12] : memref<1x12x7xf32, #tpu.memory_space<vmem>>, vector<1x4x7xf32>
    %20 = vector.shape_cast %19 : vector<1x4x7xf32> to vector<4x7xf32>
    %21 = vector.shape_cast %18 : vector<4x7xf32> to vector<1x4x7xf32>
    tpu.vector_store %arg4[%c0_11, %c8, %c0_12], %21 {strides = array<i32>} : memref<1x12x7xf32, #tpu.memory_space<vmem>>, vector<1x4x7xf32>,
    return
  }
  func.func @transform_0(%arg0: i32) -> (i32, i32, i32) {
    %c0_i32 = arith.constant 0 : i32
    %c0_i32_0 = arith.constant 0 : i32
    %c0_i32_1 = arith.constant 0 : i32
    return %arg0, %c0_i32, %c0_i32_0 : i32, i32, i32
  }
  func.func @transform_1(%arg0: i32) -> (i32, i32) {
    %c0_i32 = arith.constant 0 : i32
    %c0_i32_0 = arith.constant 0 : i32
    %c0_i32_1 = arith.constant 0 : i32
    return %c0_i32, %c0_i32_0 : i32, i32
  }
  func.func @transform_2(%arg0: i32) -> (i32, i32) {
    %c0_i32 = arith.constant 0 : i32
    %c0_i32_0 = arith.constant 0 : i32
    %c0_i32_1 = arith.constant 0 : i32
    return %c0_i32, %c0_i32_0 : i32, i32
  }
  func.func @transform_3(%arg0: i32) -> (i32, i32, i32) {
    %c0_i32 = arith.constant 0 : i32
    %c0_i32_0 = arith.constant 0 : i32
    %c0_i32_1 = arith.constant 0 : i32
    return %arg0, %c0_i32, %c0_i32_0 : i32, i32, i32
  }
}

</mosaic_0001>

<bundles_post_ra>
// kernel: mean_and_conv.1
= control target key start
LH: loop header
LB: loop body
LE: loop exit
PB: predicated region body
PF: predicated region fallthrough
CT: control target
= control target key end

     0   :  { %s351_s12 = smov 0   ;;  %s374_s0 = inlined_call_operand.vmem [shape: f32[2,8,8], index: 0, kind: input, shape index: {}]   ;;  %s375_s1 = inlined_call_operand.vmem [shape: f32[8,12], index: 1, kind: input, shape index: {}]   ;;  %s376_s2 = inlined_call_operand.vmem [shape: f32[8,1], index: 2, kind: input, shape index: {}]   ;;  %s377_s3 = inlined_call_operand.vmem [shape: f32[2,12,7], index: 3, kind: output, shape index: {}]  }
   0x1 LB: > { %s293_s13 = sadd.s32 4294967295, %s326_s12   ;;  %p297_p0 = scmp.ge.s32.totalorder %s326_s12, 1  ;;  %s326_s12 = sphi %s351_s12, %s13_s12  }
   0x2   : > { %p136_p1 = scmp.lt.s32.totalorder %s326_s12, 3 }
   0x4   : > { %p137_p2 = pnand %p297_p0, %p136_p1 }
   0x5   : > { %p159_p3 = scmp.lt.s32.totalorder (!%p137_p2), %s293_s13, 1  ;;  %s328_s22 = smov (!%p137_p2), 127  }
   0x6   : > { %140 = sbr.rel (%p137_p2) target bundleno = 267 (0x10b), region = 32  ;;  %s329_s25 = smov (!%p137_p2), 120  }
   0xb   : > { %s379_s13 = smov (!%p159_p3, %s293_s13), 1  ;;  %vm236_vm0 = vcmask 52224   ;;  %v169_v1 = vld [vmem:[%s375_s1] sm:$0xff]  ;;  %vm177_vm1 = vcmask 64512   ;;  %v330_v3 = vmov 0   ;;  %vm210_vm2 = vcmask 1043456  }
   0xc   : > { %s298_s14 = sshll.u32 %s379_s13, 3  ;;  %s306_s15 = sshll.u32 %s379_s13, 4  ;;  %v170_v2 = vld [vmem:[%s376_s2] sm:$0xff]  ;;  %318 = vset.pattern.permute.xlu1 %v330_v3  ;;  %319 = vset.pattern.permute.xlu0 %v330_v3  ;;  %vm207_vm3 = vcmask 31744   ;;  %vm234_vm4 = vcmask 56320  }
   0xd   : > { %s162_s18 = scalar_lea.vmem %s374_s0, %s298_s14  ;;  %s167_s21 = scalar_lea.vmem %s377_s3, %s306_s15  ;;  %173 = vperm.xlu1 %318, %v170_v2  }
   0xe   : > { %v168_v0 = vld [vmem:[%s162_s18] sm:$0xff] }
   0xf   : > { %205 = vrot.lane.b32.xlu0 %v168_v0, %s328_s22  ;;  %237 = vst.msk [vmem:[%s167_s21 + $0x8] sm:$0xf] %vm236_vm0, %v168_v0  ;;  %196 = vmatpush.msra.mxu0 %v168_v0 }
  0x10   : > { %301 = vmatmul.msk.f32.vlgmr.msra.gmra.mxu0 %vm177_vm1, %v169_v1 }
  0x17   : > { %202 = vrot.lane.b32.xlu0 %v169_v1, %s329_s25 }
  0x7f   : > { %v174_v6 = vpop.permute.xlu1 %173 }
  0x81   : > { %v206_v4 = vpop.permute.xlu0 %205 }
  0x82   : > { %302 = vmatpush.msk.msra.mxu1 %vm210_vm2, %v206_v4 }
  0x89   : > { %v203_v5 = vpop.permute.xlu0 %202 }
  0x8a   : > { %303 = vmatmul.msk.f32.vlgmr.msra.gmra.mxu1 %vm207_vm3, %v203_v5 }
  0x8d   : > { %v198_v7 = vpop.f32.mrf.mxu0 }
  0x8e   : > { %v201_v8 = vadd.f32 %v198_v7, %v174_v6 }
 0x107   : > { %v230_v9 = vpop.f32.mrf.mxu1 }
 0x108   : > { %v233_v10 = vadd.f32 %v230_v9, %v201_v8 }
 0x10a   : > { %235 = vst.msk [vmem:[%s167_s21] sm:$0xff] %vm234_vm4, %v233_v10 }
 0x10b PF: > { %s13_s12 = sadd.s32 1, %s326_s12  }
 0x10c   : > { %p10_p4 = scmp.ge.s32.totalorder %s13_s12, 4  }
 0x10e   :  { %12 = sbr.rel (!%p10_p4) target bundleno = 1 (0x1), region = 62 }

</bundles_post_ra>
